<compile_context>
chip_gen: v6e
topology: v6e:2x2x1
jax: 0.10.0
libtpu: 0.0.40
codegen_flags: <defaults>
</compile_context>

<pallas_src>
import jax
import jax.numpy as jnp
from jax.experimental import pallas as pl
from jax.experimental.pallas import tpu as pltpu


_LANES = 128
_SUBLANES = 8
_SMOOTH = 1e-6


def _round_up(x, m):
    return ((x + m - 1) // m) * m


def _cdiv(a, b):
    return -(-a // b)


def _vmem_budget_bytes():
    """Per-generation scoped-VMEM budget (<=48 MiB on 64 MiB-VMEM parts)."""
    try:
        cap = int(pltpu.get_tpu_info().vmem_capacity_bytes)
    except Exception:
        cap = 64 << 20          # conservative (v7x-sized) fallback
    return (64 << 20) if cap >= (128 << 20) else (48 << 20)


def _make_dice_kernel(r_tile, n_inner, rows_valid, needs_mask):
    # Tiles with global index >= first_mask_tile extend past rows_valid.
    first_mask_tile = rows_valid // r_tile

    def kernel(pred_ref, target_ref, out_ref, inter_acc, denom_acc):
        k = pl.program_id(2)

        @pl.when(k == 0)
        def _():
            inter_acc[...] = jnp.zeros_like(inter_acc)
            denom_acc[...] = jnp.zeros_like(denom_acc)

        p = pred_ref[0].astype(jnp.float32)      # (r_tile, 128)
        t = target_ref[0].astype(jnp.float32)

        def fold_accumulate(pv, tv):
            # Fold the whole block down to the (8,128) accumulators: vreg-wise
            # sublane folds (no XLU), minimal accumulator load/store traffic.
            inter_acc[...] += jnp.sum(
                (pv * tv).reshape(r_tile // _SUBLANES, _SUBLANES, _LANES), axis=0)
            denom_acc[...] += jnp.sum(
                (pv + tv).reshape(r_tile // _SUBLANES, _SUBLANES, _LANES), axis=0)

        if needs_mask:
            j_global = pl.program_id(1) * n_inner + k

            @pl.when(j_global < first_mask_tile)
            def _():
                fold_accumulate(p, t)

            @pl.when(j_global >= first_mask_tile)
            def _():
                row = (j_global * r_tile
                       + jax.lax.broadcasted_iota(jnp.int32, (r_tile, _LANES), 0))
                valid = row < rows_valid
                fold_accumulate(jnp.where(valid, p, 0.0),
                                jnp.where(valid, t, 0.0))
        else:
            fold_accumulate(p, t)

        @pl.when(k == n_inner - 1)
        def _():
            # Merged partial output: inter in sublanes 0-7, denom in 8-15.
            out_ref[0, 0, 0:_SUBLANES, :] = inter_acc[...]
            out_ref[0, 0, _SUBLANES:2 * _SUBLANES, :] = denom_acc[...]

    return kernel


def _dice_reference(pred, target):
    n = target.shape[0]
    pf = pred.reshape(n, -1).astype(jnp.float32)
    tf = target.reshape(n, -1).astype(jnp.float32)
    inter = (pf * tf).sum(1)
    dice = (2.0 * inter + _SMOOTH) / (pf.sum(1) + tf.sum(1) + _SMOOTH)
    return dice.sum() / n


def dice_metric(pred, target, *, max_row_tile=None, row_splits=None,
                force_pallas=False):
    """Dice metric over a leading batch dim (NCHW / NCDHW / flat).

    pred / target dtypes are streamed through HBM as given (bf16 preds and
    uint8/bool masks are fine); the cast to f32 happens inside the kernel.
    """
    n = target.shape[0]
    pred_flat = pred.reshape(n, -1)
    target_flat = target.reshape(n, -1)
    f = pred_flat.shape[1]

    # Tiny inputs: pallas launch overhead dominates; fused XLA path is optimal.
    total_bytes = n * f * (pred_flat.dtype.itemsize + target_flat.dtype.itemsize)
    if not force_pallas and total_bytes < (256 << 10):
        return _dice_reference(pred, target)

    # Lane/sublane-dense layout (N, rows_arr, 128).  No pad at all when F is
    # already a multiple of 1024; otherwise one minimal zero-pad (needed for
    # the lane-dense reshape; zeros are sum-neutral for both p*t and p+t).
    rows = _cdiv(f, _LANES)
    rows_arr = max(_SUBLANES, _round_up(rows, _SUBLANES))
    f_pad = rows_arr * _LANES
    if f_pad != f:
        pred_flat = jnp.pad(pred_flat, ((0, 0), (0, f_pad - f)))
        target_flat = jnp.pad(target_flat, ((0, 0), (0, f_pad - f)))
    p3 = pred_flat.reshape(n, rows_arr, _LANES)
    t3 = target_flat.reshape(n, rows_arr, _LANES)

    vmem_budget = _vmem_budget_bytes()
    if max_row_tile is None:
        # Double-buffered inputs capped at ~half the budget, <= 8192 rows.
        bytes_per_row = _LANES * (p3.dtype.itemsize + t3.dtype.itemsize)
        max_row_tile = (vmem_budget // 2) // (2 * bytes_per_row)
        max_row_tile = int(min(8192, max(_SUBLANES, max_row_tile)))
    max_row_tile = max(_SUBLANES, _round_up(int(max_row_tile), _SUBLANES))

    # Second "parallel" split over rows: single-sample reductions can use both
    # TensorCores on v7x (harmless single-core on v5e/v6e).
    if row_splits is None:
        row_splits = 2 if (n == 1 and rows_arr >= 2 * _SUBLANES) else 1
    n_outer = max(1, int(row_splits))

    # Divisor-based tiling: over-coverage bounded, masked in-kernel.
    num_tiles = max(1, _cdiv(rows_arr, max_row_tile))
    num_tiles = _round_up(num_tiles, n_outer)
    r_tile = _round_up(_cdiv(rows_arr, num_tiles), _SUBLANES)
    if n_outer > 1 and (num_tiles - 1) * r_tile >= rows_arr:
        # Splitting would create a fully out-of-range tile; fall back.
        n_outer = 1
        num_tiles = max(1, _cdiv(rows_arr, max_row_tile))
        r_tile = _round_up(_cdiv(rows_arr, num_tiles), _SUBLANES)
    n_inner = num_tiles // n_outer
    needs_mask = num_tiles * r_tile > rows_arr

    grid = (n, n_outer, n_inner)
    kernel = _make_dice_kernel(r_tile, n_inner, rows_arr, needs_mask)

    cost = pl.CostEstimate(
        flops=4 * n * num_tiles * r_tile * _LANES,
        transcendentals=0,
        bytes_accessed=(n * rows_arr * _LANES
                        * (p3.dtype.itemsize + t3.dtype.itemsize)
                        + n * n_outer * 2 * _SUBLANES * _LANES * 4),
    )

    parts = pl.pallas_call(
        kernel,
        out_shape=jax.ShapeDtypeStruct((n, n_outer, 2 * _SUBLANES, _LANES),
                                       jnp.float32),
        grid_spec=pltpu.PrefetchScalarGridSpec(
            num_scalar_prefetch=0,
            grid=grid,
            in_specs=[
                pl.BlockSpec((1, r_tile, _LANES),
                             lambda i, o, k: (i, o * n_inner + k, 0)),
                pl.BlockSpec((1, r_tile, _LANES),
                             lambda i, o, k: (i, o * n_inner + k, 0)),
            ],
            out_specs=pl.BlockSpec((1, 1, 2 * _SUBLANES, _LANES),
                                   lambda i, o, k: (i, o, 0, 0)),
            scratch_shapes=[
                pltpu.VMEM((_SUBLANES, _LANES), jnp.float32),
                pltpu.VMEM((_SUBLANES, _LANES), jnp.float32),
            ],
        ),
        compiler_params=pltpu.CompilerParams(
            dimension_semantics=("parallel", "parallel", "arbitrary"),
            vmem_limit_bytes=vmem_budget,
        ),
        cost_estimate=cost,
    )(p3, t3)

    # Final tiny reduction + dice formula outside the kernel.
    inter = parts[:, :, 0:_SUBLANES, :].sum(axis=(1, 2, 3))
    denom = parts[:, :, _SUBLANES:, :].sum(axis=(1, 2, 3))
    dice = (2.0 * inter + _SMOOTH) / (denom + _SMOOTH)
    return dice.sum() / n


if __name__ == "__main__":
    key = jax.random.PRNGKey(0)
    k1, k2, k3, k4, k5, k6, k7, k8 = jax.random.split(key, 8)

    # Test 1: canonical small segmentation shape N=2, C=4, H=W=16 (F = 1024,
    # fully aligned -> no padding, single tile per sample).
    pred = jax.nn.sigmoid(jax.random.normal(k1, (2, 4, 16, 16), dtype=jnp.float32))
    target = (jax.random.uniform(k2, (2, 4, 16, 16)) > 0.5).astype(jnp.float32)
    out = dice_metric(pred, target, force_pallas=True)
    jax.block_until_ready(out)
    ref = _dice_reference(pred, target)
    assert jnp.allclose(out, ref, atol=1e-5, rtol=1e-5), (out, ref)

    # Test 2: F not a multiple of 128 -> exercises the minimal lane-pad path.
    pred2 = jax.nn.sigmoid(jax.random.normal(k3, (2, 3, 33, 17), dtype=jnp.float32))
    target2 = (jax.random.uniform(k4, (2, 3, 33, 17)) > 0.5).astype(jnp.float32)
    out2 = dice_metric(pred2, target2, force_pallas=True)
    jax.block_until_ready(out2)
    ref2 = _dice_reference(pred2, target2)
    assert jnp.allclose(out2, ref2, atol=1e-5, rtol=1e-5), (out2, ref2)

    # Test 3: multiple row-tiles per sample (accumulation along the arbitrary
    # axis), bf16 inputs kept narrow through HBM and cast to f32 in-kernel.
    pred3 = jax.nn.sigmoid(
        jax.random.normal(k5, (2, 8, 64, 64), dtype=jnp.float32)).astype(jnp.bfloat16)
    target3 = (jax.random.uniform(k6, (2, 8, 64, 64)) > 0.5).astype(jnp.bfloat16)
    out3 = dice_metric(pred3, target3, max_row_tile=64, force_pallas=True)
    jax.block_until_ready(out3)
    ref3 = _dice_reference(pred3, target3)
    assert jnp.allclose(out3, ref3, atol=1e-3, rtol=1e-3), (out3, ref3)

    # Test 4: N=1 -> auto second parallel row split (2 TC path on v7x) plus a
    # masked partial boundary tile (r_tile does not divide rows).
    pred4 = jax.nn.sigmoid(jax.random.normal(k7, (1, 8, 64, 64), dtype=jnp.float32))
    target4 = (jax.random.uniform(k8, (1, 8, 64, 64)) > 0.5).astype(jnp.float32)
    out4 = dice_metric(pred4, target4, max_row_tile=48, force_pallas=True)
    jax.block_until_ready(out4)
    ref4 = _dice_reference(pred4, target4)
    assert jnp.allclose(out4, ref4, atol=1e-4, rtol=1e-4), (out4, ref4)

    print("KERNEL_OK")
</pallas_src>

<mosaic_0001>
module attributes {stable_mosaic.version = 11 : i64} {
  func.func @kernel(%arg0: i32, %arg1: i32, %arg2: i32, %arg3: memref<1x8x128xf32, #tpu.memory_space<vmem>>, %arg4: memref<1x8x128xf32, #tpu.memory_space<vmem>>, %arg5: memref<1x1x16x128xf32, #tpu.memory_space<vmem>>, %arg6: memref<8x128xf32, #tpu.memory_space<vmem>>, %arg7: memref<8x128xf32, #tpu.memory_space<vmem>>) attributes {dimension_semantics = [#tpu.dimension_semantics<parallel>, #tpu.dimension_semantics<parallel>, #tpu.dimension_semantics<arbitrary>], iteration_bounds = array<i64: 2, 1, 1>, scalar_prefetch = 0 : i64, scratch_operands = 2 : i64, tpu.core_type = #tpu.core_type<tc>, window_params = [{transform_indices = @transform_0, window_bounds = array<i64: 1, 8, 128>}, {transform_indices = @transform_1, window_bounds = array<i64: 1, 8, 128>}, {transform_indices = @transform_2, window_bounds = array<i64: 1, 1, 16, 128>}]} {
    %c0_i32 = arith.constant 0 : i32
    %0 = arith.cmpi eq, %arg2, %c0_i32 : i32
    %1 = arith.extui %0 : i1 to i32
    %c0_i32_0 = arith.constant 0 : i32
    %2 = arith.cmpi ne, %1, %c0_i32_0 : i32
    scf.if %2 {
      %cst_17 = arith.constant 0.000000e+00 : f32
      %22 = vector.broadcast %cst_17 : f32 to vector<8x128xf32>
      %c0_18 = arith.constant 0 : index
      %c0_19 = arith.constant 0 : index
      %23 = vector.load %arg6[%c0_18, %c0_19] : memref<8x128xf32, #tpu.memory_space<vmem>>, vector<8x128xf32>
      tpu.vector_store %arg6[%c0_18, %c0_19], %22 {strides = array<i32>} : memref<8x128xf32, #tpu.memory_space<vmem>>, vector<8x128xf32>,
      %cst_20 = arith.constant 0.000000e+00 : f32
      %24 = vector.broadcast %cst_20 : f32 to vector<8x128xf32>
      %c0_21 = arith.constant 0 : index
      %c0_22 = arith.constant 0 : index
      %25 = vector.load %arg7[%c0_21, %c0_22] : memref<8x128xf32, #tpu.memory_space<vmem>>, vector<8x128xf32>
      tpu.vector_store %arg7[%c0_21, %c0_22], %24 {strides = array<i32>} : memref<8x128xf32, #tpu.memory_space<vmem>>, vector<8x128xf32>,
    } else {
    }
    %c0 = arith.constant 0 : index
    %c0_1 = arith.constant 0 : index
    %c0_2 = arith.constant 0 : index
    %3 = vector.load %arg3[%c0, %c0_1, %c0_2] : memref<1x8x128xf32, #tpu.memory_space<vmem>>, vector<1x8x128xf32>
    %4 = vector.shape_cast %3 : vector<1x8x128xf32> to vector<8x128xf32>
    %c0_3 = arith.constant 0 : index
    %c0_4 = arith.constant 0 : index
    %c0_5 = arith.constant 0 : index
    %5 = vector.load %arg4[%c0_3, %c0_4, %c0_5] : memref<1x8x128xf32, #tpu.memory_space<vmem>>, vector<1x8x128xf32>
    %6 = vector.shape_cast %5 : vector<1x8x128xf32> to vector<8x128xf32>
    %c0_6 = arith.constant 0 : index
    %c0_7 = arith.constant 0 : index
    %7 = vector.load %arg6[%c0_6, %c0_7] : memref<8x128xf32, #tpu.memory_space<vmem>>, vector<8x128xf32>
    %8 = arith.mulf %4, %6 : vector<8x128xf32>
    %9 = vector.shape_cast %8 : vector<8x128xf32> to vector<1x8x128xf32>
    %cst = arith.constant dense<0.000000e+00> : vector<8x128xf32>
    %10 = vector.multi_reduction <add>, %9, %cst [0] : vector<1x8x128xf32> to vector<8x128xf32>
    %11 = arith.addf %7, %10 : vector<8x128xf32>
    %c0_8 = arith.constant 0 : index
    %c0_9 = arith.constant 0 : index
    %12 = vector.load %arg6[%c0_8, %c0_9] : memref<8x128xf32, #tpu.memory_space<vmem>>, vector<8x128xf32>
    tpu.vector_store %arg6[%c0_8, %c0_9], %11 {strides = array<i32>} : memref<8x128xf32, #tpu.memory_space<vmem>>, vector<8x128xf32>,
    %c0_10 = arith.constant 0 : index
    %c0_11 = arith.constant 0 : index
    %13 = vector.load %arg7[%c0_10, %c0_11] : memref<8x128xf32, #tpu.memory_space<vmem>>, vector<8x128xf32>
    %14 = arith.addf %4, %6 : vector<8x128xf32>
    %15 = vector.shape_cast %14 : vector<8x128xf32> to vector<1x8x128xf32>
    %cst_12 = arith.constant dense<0.000000e+00> : vector<8x128xf32>
    %16 = vector.multi_reduction <add>, %15, %cst_12 [0] : vector<1x8x128xf32> to vector<8x128xf32>
    %17 = arith.addf %13, %16 : vector<8x128xf32>
    %c0_13 = arith.constant 0 : index
    %c0_14 = arith.constant 0 : index
    %18 = vector.load %arg7[%c0_13, %c0_14] : memref<8x128xf32, #tpu.memory_space<vmem>>, vector<8x128xf32>
    tpu.vector_store %arg7[%c0_13, %c0_14], %17 {strides = array<i32>} : memref<8x128xf32, #tpu.memory_space<vmem>>, vector<8x128xf32>,
    %c0_i32_15 = arith.constant 0 : i32
    %19 = arith.cmpi eq, %arg2, %c0_i32_15 : i32
    %20 = arith.extui %19 : i1 to i32
    %c0_i32_16 = arith.constant 0 : i32
    %21 = arith.cmpi ne, %20, %c0_i32_16 : i32
    scf.if %21 {
      %c0_17 = arith.constant 0 : index
      %c0_18 = arith.constant 0 : index
      %22 = vector.load %arg6[%c0_17, %c0_18] : memref<8x128xf32, #tpu.memory_space<vmem>>, vector<8x128xf32>
      %c0_19 = arith.constant 0 : index
      %c0_20 = arith.constant 0 : index
      %c0_21 = arith.constant 0 : index
      %c0_22 = arith.constant 0 : index
      %23 = vector.load %arg5[%c0_19, %c0_20, %c0_21, %c0_22] : memref<1x1x16x128xf32, #tpu.memory_space<vmem>>, vector<1x1x8x128xf32>
      %24 = vector.shape_cast %23 : vector<1x1x8x128xf32> to vector<8x128xf32>
      %25 = vector.shape_cast %22 : vector<8x128xf32> to vector<1x1x8x128xf32>
      tpu.vector_store %arg5[%c0_19, %c0_20, %c0_21, %c0_22], %25 {strides = array<i32>} : memref<1x1x16x128xf32, #tpu.memory_space<vmem>>, vector<1x1x8x128xf32>,
      %c0_23 = arith.constant 0 : index
      %c0_24 = arith.constant 0 : index
      %26 = vector.load %arg7[%c0_23, %c0_24] : memref<8x128xf32, #tpu.memory_space<vmem>>, vector<8x128xf32>
      %c0_25 = arith.constant 0 : index
      %c0_26 = arith.constant 0 : index
      %c8 = arith.constant 8 : index
      %c0_27 = arith.constant 0 : index
      %27 = vector.load %arg5[%c0_25, %c0_26, %c8, %c0_27] : memref<1x1x16x128xf32, #tpu.memory_space<vmem>>, vector<1x1x8x128xf32>
      %28 = vector.shape_cast %27 : vector<1x1x8x128xf32> to vector<8x128xf32>
      %29 = vector.shape_cast %26 : vector<8x128xf32> to vector<1x1x8x128xf32>
      tpu.vector_store %arg5[%c0_25, %c0_26, %c8, %c0_27], %29 {strides = array<i32>} : memref<1x1x16x128xf32, #tpu.memory_space<vmem>>, vector<1x1x8x128xf32>,
    } else {
    }
    return
  }
  func.func @transform_0(%arg0: i32, %arg1: i32, %arg2: i32) -> (i32, i32, i32) {
    %c1_i32 = arith.constant 1 : i32
    %0 = arith.muli %arg1, %c1_i32 : i32
    %1 = arith.addi %0, %arg2 : i32
    %c0_i32 = arith.constant 0 : i32
    %c0_i32_0 = arith.constant 0 : i32
    return %arg0, %1, %c0_i32 : i32, i32, i32
  }
  func.func @transform_1(%arg0: i32, %arg1: i32, %arg2: i32) -> (i32, i32, i32) {
    %c1_i32 = arith.constant 1 : i32
    %0 = arith.muli %arg1, %c1_i32 : i32
    %1 = arith.addi %0, %arg2 : i32
    %c0_i32 = arith.constant 0 : i32
    %c0_i32_0 = arith.constant 0 : i32
    return %arg0, %1, %c0_i32 : i32, i32, i32
  }
  func.func @transform_2(%arg0: i32, %arg1: i32, %arg2: i32) -> (i32, i32, i32, i32) {
    %c0_i32 = arith.constant 0 : i32
    %c0_i32_0 = arith.constant 0 : i32
    %c0_i32_1 = arith.constant 0 : i32
    return %arg0, %arg1, %c0_i32, %c0_i32_0 : i32, i32, i32, i32
  }
}

</mosaic_0001>

<bundles_post_ra>
// kernel: tpu_custom_call.1
= control target key start
LH: loop header
LB: loop body
LE: loop exit
PB: predicated region body
PF: predicated region fallthrough
CT: control target
= control target key end

     0   :  { %7 = vsyncpa [#allocation5], 0  ;;  %s811_s0 = inlined_call_operand.hbm [shape: f32[2,8,128], index: 0, kind: input, shape index: {}]   ;;  %s812_s1 = inlined_call_operand.hbm [shape: f32[2,8,128], index: 1, kind: input, shape index: {}]   ;;  %s813_s2 = inlined_call_operand.hbm [shape: f32[2,1,16,128], index: 2, kind: output, shape index: {}]  }
   0x1   :  { %9 = vsyncpa [#allocation5 + $0x1], 0 }
   0x2   :  { %10 = vsyncpa [#allocation8], 0 }
   0x3   :  { %12 = vsyncpa [#allocation8 + $0x1], 0 }
   0x4   :  { %13 = vsyncpa [#allocation6], 0 }
   0x5   :  { %15 = vsyncpa [#allocation6 + $0x1], 0  ;;  %s635_s9 = smov 0   ;;  %s637_s10 = smov 0  }
   0x6   :  { %s639_s11 = smov 0   ;;  %s641_s12 = smov 0  }
   0x7   :  { %s643_s13 = smov 0   ;;  %s645_s14 = smov 0  }
   0x8 LB: > { %s386_s15 = sadd.s32 4294967295, %s613_s14   ;;  %s387_s16 = sadd.s32 4294967294, %s613_s14   ;;  %s613_s14 = sphi %s645_s14, %s21_s14   ;;  %s609_s13 = sphi %s643_s13, %s825_s13   ;;  %s605_s12 = sphi %s641_s12, %s824_s12   ;;  %s601_s11 = sphi %s639_s11, %s823_s11   ;;  %s597_s10 = sphi %s637_s10, %s822_s10   ;;  %s593_s9 = sphi %s635_s9, %s821_s9  }
   0x9   : > { %s40_s17 = sadd.s32 1, %s609_s13  ;;  %s51_s18 = sadd.s32 1, %s601_s11 }
   0xa   : > { %p42_p0 = scmp.ge.s32.totalorder %s40_s17, 2  ;;  %p58_p1 = scmp.ne.s32.totalorder %s601_s11, %s597_s10 }
   0xb   : > { %p59_p2 = scmp.eq.s32.totalorder %s613_s14, 0  ;;  %p64_p3 = scmp.ne.s32.totalorder %s597_s10, %s593_s9 }
   0xc   : > { %s827_s17 = smov (%p42_p0, %s40_s17), 0  ;;  %p65_p5 = scmp.eq.s32.totalorder %s386_s15, 0 }
   0xd   : > { %p676_p4 = por %p59_p2, %p58_p1  ;;  %s46_s20 = ssub.s32 %s609_s13, %s827_s17 }
   0xe   : > { %p120_p6 = scmp.eq.s32.totalorder %s386_s15, 1  ;;  %p49_p7 = scmp.eq.s32.totalorder %s46_s20, 0 }
   0xf   : > { %p682_p8 = por %p65_p5, %p64_p3  ;;  %p126_p10 = scmp.eq.s32.totalorder %s387_s16, 1 }
  0x10   : > { %p686_p9 = por %p120_p6, %p58_p1  ;;  %p421_p13 = scmp.lt.s32.totalorder %s613_s14, 2 }
  0x11   : > { %s691_s23 = scalar_select %p49_p7, %s601_s11, %s51_s18  }
  0x12   : > { %p693_p11 = por %p126_p10, %p64_p3  ;;  %s700_s25 = sand.u32 1, %s601_s11  }
  0x13   : > { %s390_s26 = sshll.u32 %s700_s25, 3  ;;  %s391_s27 = sshll.u32 %s609_s13, 7 }
  0x14   : > { %s157_s30 = scalar_lea.hbm %s811_s0, %s391_s27  ;;  %s150_s3 = scalar_lea.vmem [#allocation4], %s390_s26 }
  0x15   : > { %s159_s4 = sshll.u32 %s150_s3, 4  ;;  %p709_p0 = pnand %p421_p13, %p676_p4  ;;  %s160_s4 = int_to_ptr.vmem [resolvable:$true] %s159_s4 }
  0x16   : > { %p394_p1 = scmp.ge.s32.totalorder %s613_s14, 1  ;;  %p184_p2 = scmp.lt.s32.totalorder %s613_s14, 3 }
  0x17   : > { %s147_s6 = scalar_lea.sflag [#allocation5], %s700_s25  ;;  %p475_p3 = pneg %p709_p0 }
  0x18   : > { %s486_s7 = scalar_lea.vmem %s160_s4, 128  ;;  %s615_s8 = smov [#allocation4]  }
  0x19   : > { %p487_p5 = scmp.ne.s32.totalorder %s160_s4, %s486_s7  ;;  %s491_s15 = sshll.u32 %s615_s8, 4  ;;  %s492_s15 = int_to_ptr.vmem [resolvable:$false] %s491_s15 }
  0x1a   : > { %s493_s16 = scalar_lea.vmem %s492_s15, 256  ;;  %p494_p4 = scmp.lt.s32.totalorder %s160_s4, %s492_s15 }
  0x1b   : > { %p489_p6 = pnand %p487_p5, %p475_p3  ;;  %p495_p10 = scmp.lt.s32.totalorder %s493_s16, %s486_s7 }
  0x1d   : > { %p490_p7 = pneg %p489_p6  ;;  %p496_p13 = por %p495_p10, %p494_p4 }
  0x1f   : > { %p497_p12 = pnand %p496_p13, %p490_p7 }
  0x21   : > { %500 = shalt.err (!%p497_p12)
}
  0x22   : > { %413 = dma.hbm_to_vmem [thread:$0]  (!%p709_p0), %s157_s30, 128, %s160_s4, %s147_s6  }
  0x23   : > { %p727_p5 = pnand %p394_p1, %p184_p2  ;;  %s177_s28 = scalar_lea.hbm %s812_s1, %s391_s27 }
  0x24   : > { %s170_s29 = scalar_lea.vmem [#allocation7], %s390_s26  ;;  %s167_s7 = scalar_lea.sflag [#allocation8], %s700_s25 }
  0x25   : > { %s179_s3 = sshll.u32 %s170_s29, 4  ;;  %s616_s30 = smov [#allocation7]   ;;  %s180_s3 = int_to_ptr.vmem [resolvable:$true] %s179_s3 }
  0x26   : > { %s514_s8 = scalar_lea.vmem %s180_s3, 128  ;;  %s519_s4 = sshll.u32 %s616_s30, 4  ;;  %s520_s4 = int_to_ptr.vmem [resolvable:$false] %s519_s4 }
  0x27   : > { %p515_p12 = scmp.ne.s32.totalorder %s180_s3, %s514_s8  ;;  %s521_s6 = scalar_lea.vmem %s520_s4, 256 }
  0x28   : > { %p522_p1 = scmp.lt.s32.totalorder %s180_s3, %s520_s4  ;;  %p523_p2 = scmp.lt.s32.totalorder %s521_s6, %s514_s8 }
  0x29   : > { %p517_p6 = pnand %p515_p12, %p475_p3 }
  0x2a   : > { %p524_p4 = por %p523_p2, %p522_p1 }
  0x2b   : > { %p518_p7 = pneg %p517_p6 }
  0x2d   : > { %p525_p10 = pnand %p524_p4, %p518_p7 }
  0x2f   : > { %528 = shalt.err (!%p525_p10)
}
  0x30   : > { %416 = dma.hbm_to_vmem [thread:$0]  (!%p709_p0), %s177_s28, 128, %s180_s3, %s167_s7  }
  0x31   : > { %188 = sbr.rel (%p727_p5) target bundleno = 82 (0x52), region = 28  ;;  %s743_s25 = sand.u32 (!%p727_p5), 1, %s597_s10  }
  0x32   : > { %s395_s26 = sshll.u32 (!%p727_p5), %s743_s25, 3  ;;  %s191_s27 = scalar_lea.sflag (!%p727_p5), [#allocation5], %s743_s25 }
  0x33   : > { %s194_s15 = scalar_lea.vmem (!%p727_p5), [#allocation4], %s395_s26 }
  0x36   : > { %580 = dma.done.wait (%p682_p8), %s191_s27, 128  }
  0x37   : > { %582 = vsyncadd (%p682_p8), %s191_s27, 4294967168  ;;  %s200_s5 = scalar_lea.sflag [#allocation8], %s743_s25  ;;  %s203_s16 = scalar_lea.vmem [#allocation7], %s395_s26 }
  0x38   : > { %584 = dma.done.wait (%p682_p8), %s200_s5, 128  }
  0x39   : > { %586 = vsyncadd (%p682_p8), %s200_s5, 4294967168  ;;  %s397_s18 = sshll.u32 %s743_s25, 4  ;;  %s403_s28 = sshll.u32 %s605_s12, 8  ;;  %v237_v0 = vld [vmem:[%s194_s15] sm:$0xff]  ;;  %v238_v1 = vld [vmem:[%s203_s16] sm:$0xff] }
  0x3a   : > { %s228_s19 = scalar_lea.vmem [#allocation9], %s397_s18  ;;  %s763_s21 = scalar_lea.hbm %s813_s2, %s403_s28  ;;  %v240_v2 = vmul.f32 %v238_v1, %v237_v0  ;;  %v245_v3 = vadd.f32 %v238_v1, %v237_v0 }
  0x3b   : > { %s272_s20 = sshll.u32 %s228_s19, 4  ;;  %s257_s7 = scalar_lea.sflag [#allocation6], %s743_s25  ;;  %s758_s20 = int_to_ptr.vmem [resolvable:$true] %s272_s20 }
  0x3c   : > { %253 = vst [vmem:[%s228_s19] sm:$0xff] %v240_v2  ;;  %255 = vst [vmem:[%s228_s19 + $0x8] sm:$0xff] %v245_v3  ;;  %s529_s8 = scalar_lea.vmem %s758_s20, 256  ;;  %s617_s12 = smov [#allocation9]  }
  0x3d   : > { %p530_p8 = scmp.ne.s32.totalorder %s758_s20, %s529_s8  ;;  %s533_s30 = sshll.u32 %s617_s12, 4  ;;  %s534_s30 = int_to_ptr.vmem [resolvable:$false] %s533_s30 }
  0x3e   : > { %s535_s4 = scalar_lea.vmem %s534_s30, 512  ;;  %p536_p13 = scmp.lt.s32.totalorder %s758_s20, %s534_s30 }
  0x3f   : > { %p531_p0 = pnand %p530_p8, %p686_p9  ;;  %p537_p5 = scmp.lt.s32.totalorder %s535_s4, %s529_s8 }
  0x41   : > { %p532_p3 = pneg %p531_p0  ;;  %p538_p12 = por %p537_p5, %p536_p13 }
  0x43   : > { %p539_p6 = pnand %p538_p12, %p532_p3 }
  0x45   : > { %542 = shalt.err (!%p539_p6)
}
  0x46   : > { %s543_s6 = scalar_lea.hbm %s763_s21, 256  ;;  %s547_s15 = scalar_lea.hbm %s813_s2, 512 }
  0x47   : > { %p544_p7 = scmp.ne.s32.totalorder %s763_s21, %s543_s6  ;;  %p548_p4 = scmp.lt.s32.totalorder %s763_s21, %s813_s2 }
  0x48   : > { %p549_p10 = scmp.lt.s32.totalorder %s547_s15, %s543_s6 }
  0x49   : > { %p545_p1 = pnand %p544_p7, %p686_p9 }
  0x4a   : > { %p550_p8 = por %p549_p10, %p548_p4 }
  0x4b   : > { %p546_p2 = pneg %p545_p1 }
  0x4d   : > { %p551_p0 = pnand %p550_p8, %p546_p2 }
  0x4f   : > { %554 = shalt.err (!%p551_p0)
}
  0x50   : > { %s618_s18 = smov 128   ;;  %s619_s19 = smov 8  }
  0x51   : > { %408 = dma.vmem_to_hbm [thread:$0]  (%p686_p9), %s758_s20, 256, %s763_s21, %s257_s7, %s618_s18, %s618_s18, %s619_s19  }
  0x52 PF: > { %s287_s28 = sand.u32 1, %s593_s9   ;;  %p820_p3 = scmp.ge.s32.totalorder %s613_s14, 2 }
  0x53   : > { %s288_s29 = scalar_lea.sflag [#allocation6], %s287_s28 }
  0x54   : > { %p418_p13 = pnand %p820_p3, %p693_p11 }
  0x56   : > { %p419_p5 = pneg %p418_p13 }
  0x58   : > { %588 = dma.done.wait (%p419_p5), %s288_s29, 256  }
  0x59   : > { %590 = vsyncadd (%p419_p5), %s288_s29, 4294967040  ;;  %s21_s14 = sadd.s32 1, %s613_s14   ;;  %s821_s9 = smov %s597_s10 }
  0x5a   : > { %p18_p12 = scmp.ge.s32.totalorder %s21_s14, 4   ;;  %s822_s10 = smov %s601_s11 }
  0x5b   : > { %s823_s11 = smov %s691_s23  ;;  %s824_s12 = smov %s609_s13 }
  0x5c   : > { %s825_s13 = smov %s827_s17  ;;  %20 = sbr.rel (!%p18_p12) target bundleno = 8 (0x8), region = 94 }
  0x61   :  { %293 = vsyncpa [#allocation5], 1 }
  0x62   :  { %295 = vsyncpa [#allocation5 + $0x1], 1 }
  0x63   :  { %296 = vsyncpa [#allocation8], 1 }
  0x64   :  { %298 = vsyncpa [#allocation8 + $0x1], 1 }
  0x65   :  { %299 = vsyncpa [#allocation6], 1 }
  0x66   :  { %301 = vsyncpa [#allocation6 + $0x1], 1 }

</bundles_post_ra>
